<compile_context>
chip_gen: v6e
topology: v6e:2x2x1
jax: 0.10.0
libtpu: 0.0.40
codegen_flags: <defaults>
</compile_context>

<pallas_src>
import functools

import jax
import jax.numpy as jnp
from jax.experimental import pallas as pl
from jax.experimental.pallas import tpu as pltpu


def _round_up(x, m):
    return ((x + m - 1) // m) * m


def _pick_col_tile(n):
    for t in (512, 256, 128):
        if n % t == 0:
            return t
    return 128


def _pick_seq_tile(s):
    for t in (64, 32, 16, 8):
        if s % t == 0:
            return t
    # TODO(synk): sequences not divisible by 8 fall back to one whole-sequence
    # tile per batch row (static DMA-unroll of length S inside the kernel).
    return s


_VMEM_LIMIT = 32 * 1024 * 1024  # explicit bound; safe on v5e/v6e/v7x


# -----------------------------------------------------------------------------
# Shared tiled GEMM kernel:  out_tile = lhs @ w_tile   (bf16 in, f32 acc/out).
# Grid runs over output-column tiles; the LHS index_map is constant so the LHS
# stays VMEM-resident across tiles; weight tiles are double-buffered by the
# auto-pipeline.  Output tiles are 128-lane multiples -> unmasked stores.
# -----------------------------------------------------------------------------
def _tiled_matmul_kernel(lhs_ref, w_ref, o_ref):
    o_ref[...] = jnp.dot(lhs_ref[...], w_ref[...],
                         preferred_element_type=jnp.float32)


def _tiled_matmul(lhs_f32, w_f32, n_valid):
    """lhs (M, K) f32, w (K, N) f32 -> (M, n_valid) f32, tiled over N."""
    m, k = lhs_f32.shape
    n = w_f32.shape[1]
    n_pad = _round_up(n, 128)
    lhs = lhs_f32.astype(jnp.bfloat16)
    w = w_f32.astype(jnp.bfloat16)          # cast first, pad in bf16 (fewer bytes)
    if n_pad > n:
        w = jnp.pad(w, ((0, 0), (0, n_pad - n)))
    tn = _pick_col_tile(n_pad)
    grid = (n_pad // tn,)
    # TODO(synk): for very large K the contraction axis would also need a grid
    # dimension with an f32 VMEM accumulator; K is small here.
    out = pl.pallas_call(
        _tiled_matmul_kernel,
        grid=grid,
        in_specs=[
            pl.BlockSpec((m, k), lambda j: (0, 0)),    # LHS resident
            pl.BlockSpec((k, tn), lambda j: (0, j)),   # stream weight tiles
        ],
        out_specs=pl.BlockSpec((m, tn), lambda j: (0, j)),  # lane-dense stores
        out_shape=jax.ShapeDtypeStruct((m, n_pad), jnp.float32),
        compiler_params=pltpu.CompilerParams(
            dimension_semantics=("parallel",),
            vmem_limit_bytes=_VMEM_LIMIT),
        cost_estimate=pl.CostEstimate(
            flops=2 * m * k * n_pad,
            transcendentals=0,
            bytes_accessed=m * k * 2 + k * n_pad * 2 + m * n_pad * 4),
    )(lhs, w)
    return out[:, :n_valid]


# -----------------------------------------------------------------------------
# Classifier stand-in: one fused GEMM for (img_mlc | img_emb | img_emb2).
# -----------------------------------------------------------------------------
def classifier_forward(image, w_mlc, w_emb1, w_emb2, num_topics, embed_dim):
    b = image.shape[0]
    f = w_mlc.shape[0]
    t = num_topics
    te = num_topics * embed_dim
    x = image.reshape(b, f)                      # glue: NCHW -> (B, C*H*W)
    # In a real deployment the fused weight would be prepared once, not per call.
    w_cat = jnp.concatenate([w_mlc, w_emb1, w_emb2], axis=1)   # (f, t + 2*te)
    out = _tiled_matmul(x, w_cat, t + 2 * te)    # (B, t + 2*te) f32
    img_mlc = out[:, :t]
    img_emb = out[:, t:t + te].reshape(b, num_topics, embed_dim)
    img_emb2 = out[:, t + te:t + 2 * te].reshape(b, num_topics, embed_dim)
    return img_mlc, img_emb, img_emb2


# -----------------------------------------------------------------------------
# Context vector kernel:
#   ctx = mean_T(img_emb + img_emb2) + 2 * mean_T(label_embedding)
# (equivalent to mean over topics of src_emb + src_emb2; label broadcast folded,
#  so no (B, T, E) src_emb / src_emb2 temporaries are materialized).
# -----------------------------------------------------------------------------
def _ctx_kernel(e1_ref, e2_ref, lbl_ref, ctx_ref):
    lbl_mean = jnp.mean(lbl_ref[...], axis=0, keepdims=True)          # (1, E)
    ctx_ref[...] = (jnp.mean(e1_ref[...] + e2_ref[...], axis=1)
                    + 2.0 * lbl_mean)                                 # (B, E)


def compute_context_vector(img_emb, img_emb2, lbl_table):
    b, t, e = img_emb.shape
    return pl.pallas_call(
        _ctx_kernel,
        grid=(1,),
        in_specs=[pl.BlockSpec((b, t, e), lambda i: (0, 0, 0)),
                  pl.BlockSpec((b, t, e), lambda i: (0, 0, 0)),
                  pl.BlockSpec((t, e), lambda i: (0, 0))],
        out_specs=pl.BlockSpec((b, e), lambda i: (0, 0)),
        out_shape=jax.ShapeDtypeStruct((b, e), jnp.float32),
        compiler_params=pltpu.CompilerParams(
            vmem_limit_bytes=_VMEM_LIMIT),
    )(img_emb, img_emb2, lbl_table)


# -----------------------------------------------------------------------------
# Gather + fuse kernel (caption != None branch, generator front-end stand-in):
#   grid = (B, S // TILE_S).  caption is scalar-prefetched (SMEM) and drives a
#   manual DMA gather of TILE_S token-embedding rows per step from the HBM
#   token table (memory_space=pl.ANY) into VMEM scratch; the row DMAs overlap
#   each other.  pad_mask (caption == pad_id) and the ctx add are fused here.
# -----------------------------------------------------------------------------
def _gather_fuse_kernel(cap_sref, cap_ref, ctx_ref, tok_hbm, o_ref,
                        buf, sems, *, tile_s, seq, pad_id):
    b = pl.program_id(0)
    ts = pl.program_id(1)
    base = b * seq + ts * tile_s

    # Issue all row gathers; they stay in flight concurrently.
    copies = []
    for j in range(tile_s):
        tok = cap_sref[base + j]                               # scalar (SMEM)
        cp = pltpu.make_async_copy(tok_hbm.at[pl.ds(tok, 1), :],
                                   buf.at[pl.ds(j, 1), :],
                                   sems.at[j])
        cp.start()
        copies.append(cp)
    for cp in copies:
        cp.wait()

    keep = (cap_ref[0] != pad_id).astype(jnp.float32)          # (tile_s, 1)
    o_ref[0] = (buf[...] + ctx_ref[0]) * keep                  # (tile_s, E)


def context_gather_fuse(ctx, caption, tok_table, pad_id):
    b, e = ctx.shape
    s = caption.shape[1]
    tile_s = _pick_seq_tile(s)
    cap_flat = caption.reshape(b * s).astype(jnp.int32)        # SMEM prefetch
    cap3 = caption.reshape(b, s, 1).astype(jnp.int32)          # vector mask input
    ctx3 = ctx.reshape(b, 1, e)

    kernel = functools.partial(_gather_fuse_kernel, tile_s=tile_s, seq=s,
                               pad_id=pad_id)
    cap_emb = pl.pallas_call(
        kernel,
        grid_spec=pltpu.PrefetchScalarGridSpec(
            num_scalar_prefetch=1,
            grid=(b, s // tile_s),
            in_specs=[
                pl.BlockSpec((1, tile_s, 1), lambda bb, tt, cap: (bb, tt, 0)),
                pl.BlockSpec((1, 1, e), lambda bb, tt, cap: (bb, 0, 0)),
                pl.BlockSpec(memory_space=pl.ANY),   # token table stays in HBM
            ],
            out_specs=pl.BlockSpec((1, tile_s, e),
                                   lambda bb, tt, cap: (bb, tt, 0)),
            scratch_shapes=[pltpu.VMEM((tile_s, e), jnp.float32),
                            pltpu.SemaphoreType.DMA((tile_s,))],
        ),
        out_shape=jax.ShapeDtypeStruct((b, s, e), jnp.float32),
        compiler_params=pltpu.CompilerParams(
            dimension_semantics=("parallel", "arbitrary"),
            vmem_limit_bytes=_VMEM_LIMIT),
    )(cap_flat, cap3, ctx3, tok_table)
    return cap_emb


# -----------------------------------------------------------------------------
# Generator stand-in output projection: cap_gen = cap_emb @ W_out,
# tiled over 128-lane vocab tiles (lane-dense stores, bf16 weight streaming).
# -----------------------------------------------------------------------------
def generator_output_proj(cap_emb_2d, w_out):
    v = w_out.shape[1]
    return _tiled_matmul(cap_emb_2d, w_out, v)


# -----------------------------------------------------------------------------
# Full Context.forward (caption provided).
#   get_emb=False -> (cap_gen, img_mlc);  get_emb=True -> (cap_gen, img_mlc, cap_emb)
# -----------------------------------------------------------------------------
def context_forward(params, image, caption, pad_id=3, get_emb=False):
    num_topics, embed_dim = params['label_embedding'].shape
    b = image.shape[0]
    s = caption.shape[1]
    v = params['tok_table'].shape[0]

    img_mlc, img_emb, img_emb2 = classifier_forward(
        image, params['w_mlc'], params['w_emb1'], params['w_emb2'],
        num_topics, embed_dim)

    # lbl_idx == arange(num_topics) for every batch row, so the label lookup is
    # the full table; its broadcast over batch/topics is folded into ctx.
    ctx = compute_context_vector(img_emb, img_emb2, params['label_embedding'])

    cap_emb = context_gather_fuse(ctx, caption, params['tok_table'], pad_id)

    cap_gen = generator_output_proj(
        cap_emb.reshape(b * s, embed_dim), params['w_out']).reshape(b, s, v)

    # TODO(synk): the caption==None branch (autoregressive generation loop with
    # bos_id/eos_id/max_len) has no clean single-kernel Pallas equivalent here.
    if get_emb:
        return cap_gen, img_mlc, cap_emb
    return cap_gen, img_mlc


def make_params(key, c, h, w, num_topics, embed_dim, vocab):
    f = c * h * w
    ks = jax.random.split(key, 6)
    scale = 0.02
    return {
        'w_mlc': scale * jax.random.normal(ks[0], (f, num_topics), jnp.float32),
        'w_emb1': scale * jax.random.normal(ks[1], (f, num_topics * embed_dim), jnp.float32),
        'w_emb2': scale * jax.random.normal(ks[2], (f, num_topics * embed_dim), jnp.float32),
        'label_embedding': scale * jax.random.normal(ks[3], (num_topics, embed_dim), jnp.float32),
        'tok_table': scale * jax.random.normal(ks[4], (vocab, embed_dim), jnp.float32),
        'w_out': scale * jax.random.normal(ks[5], (embed_dim, vocab), jnp.float32),
    }


if __name__ == "__main__":
    B, C, H, W = 2, 4, 16, 16
    NUM_TOPICS, EMBED_DIM = 8, 32
    VOCAB, SEQ = 64, 8
    PAD_ID = 3

    key = jax.random.PRNGKey(0)
    k_img, k_cap, k_par = jax.random.split(key, 3)

    image = jax.random.normal(k_img, (B, C, H, W), jnp.float32)
    caption = jax.random.randint(k_cap, (B, SEQ), 0, VOCAB, jnp.int32)
    caption = caption.at[:, -2:].set(PAD_ID)  # make some pad positions

    params = make_params(k_par, C, H, W, NUM_TOPICS, EMBED_DIM, VOCAB)

    cap_gen, img_mlc = context_forward(params, image, caption, pad_id=PAD_ID)
    jax.block_until_ready((cap_gen, img_mlc))

    assert cap_gen.shape == (B, SEQ, VOCAB)
    assert img_mlc.shape == (B, NUM_TOPICS)
    print("KERNEL_OK")
</pallas_src>

<mosaic_0001>
module attributes {stable_mosaic.version = 11 : i64} {
  func.func @_tiled_matmul_kernel(%arg0: i32, %arg1: memref<2x1024xbf16, #tpu.memory_space<vmem>>, %arg2: memref<1024x128xbf16, #tpu.memory_space<vmem>>, %arg3: memref<2x128xf32, #tpu.memory_space<vmem>>) attributes {dimension_semantics = [#tpu.dimension_semantics<parallel>], iteration_bounds = array<i64: 5>, scalar_prefetch = 0 : i64, scratch_operands = 0 : i64, tpu.core_type = #tpu.core_type<tc>, window_params = [{pipeline_mode = #tpu.pipeline_mode<synchronous>, transform_indices = @transform_0, window_bounds = array<i64: 2, 1024>}, {transform_indices = @transform_1, window_bounds = array<i64: 1024, 128>}, {transform_indices = @transform_2, window_bounds = array<i64: 2, 128>}]} {
    %c0 = arith.constant 0 : index
    %c0_0 = arith.constant 0 : index
    %0 = vector.load %arg1[%c0, %c0_0] : memref<2x1024xbf16, #tpu.memory_space<vmem>>, vector<2x1024xbf16>
    %c0_1 = arith.constant 0 : index
    %c0_2 = arith.constant 0 : index
    %1 = vector.load %arg2[%c0_1, %c0_2] : memref<1024x128xbf16, #tpu.memory_space<vmem>>, vector<1024x128xbf16>
    %cst = arith.constant dense<0.000000e+00> : vector<2x128xf32>
    %2 = tpu.matmul %0, %1, %cst {dimension_numbers = #tpu.dot_dimension_numbers<[1], [0], [0], [1], [0, 0, 1, 1], [], []>} : vector<2x1024xbf16>, vector<1024x128xbf16>, vector<2x128xf32> -> vector<2x128xf32>
    %c0_3 = arith.constant 0 : index
    %c0_4 = arith.constant 0 : index
    %3 = vector.load %arg3[%c0_3, %c0_4] : memref<2x128xf32, #tpu.memory_space<vmem>>, vector<2x128xf32>
    tpu.vector_store %arg3[%c0_3, %c0_4], %2 {strides = array<i32>} : memref<2x128xf32, #tpu.memory_space<vmem>>, vector<2x128xf32>,
    return
  }
  func.func @transform_0(%arg0: i32) -> (i32, i32) {
    %c0_i32 = arith.constant 0 : i32
    %c0_i32_0 = arith.constant 0 : i32
    %c0_i32_1 = arith.constant 0 : i32
    return %c0_i32, %c0_i32_0 : i32, i32
  }
  func.func @transform_1(%arg0: i32) -> (i32, i32) {
    %c0_i32 = arith.constant 0 : i32
    %c0_i32_0 = arith.constant 0 : i32
    return %c0_i32, %arg0 : i32, i32
  }
  func.func @transform_2(%arg0: i32) -> (i32, i32) {
    %c0_i32 = arith.constant 0 : i32
    %c0_i32_0 = arith.constant 0 : i32
    return %c0_i32, %arg0 : i32, i32
  }
}

</mosaic_0001>

<bundles_post_ra>
// kernel: tpu_custom_call.1
= control target key start
LH: loop header
LB: loop body
LE: loop exit
PB: predicated region body
PF: predicated region fallthrough
CT: control target
= control target key end

     0   :  { %7 = vsyncpa [#allocation3], 0  ;;  %s1692_s0 = inlined_call_operand.hbm [shape: bf16[2,1024], index: 0, kind: input, shape index: {}]   ;;  %s1693_s1 = inlined_call_operand.hbm [shape: bf16[1024,640], index: 1, kind: input, shape index: {}]   ;;  %s1694_s2 = inlined_call_operand.hbm [shape: f32[2,640], index: 2, kind: output, shape index: {}]  }
   0x1   :  { %8 = vsyncpa [#allocation6], 0 }
   0x2   :  { %10 = vsyncpa [#allocation6 + $0x1], 0 }
   0x3   :  { %11 = vsyncpa [#allocation4], 0 }
   0x4   :  { %13 = vsyncpa [#allocation4 + $0x1], 0  ;;  %s1441_s9 = smov 0   ;;  %s1443_s10 = smov 0  }
   0x5   :  { %s1445_s11 = smov 0   ;;  %s1447_s12 = smov 0  }
   0x6 LB: > { %s1462_s13 = sadd.s32 4294967295, %s1417_s12   ;;  %s1003_s14 = sadd.s32 4294967294, %s1417_s12   ;;  %s1417_s12 = sphi %s1447_s12, %s1715_s12   ;;  %s1413_s11 = sphi %s1445_s11, %s1714_s11   ;;  %s1409_s10 = sphi %s1443_s10, %s1713_s10   ;;  %s1405_s9 = sphi %s1441_s9, %s1712_s9  }
   0x7   : > { %s1466_s15 = sadd.s32 1, %s1417_s12   ;;  %s47_s16 = sadd.s32 1, %s1413_s11 }
   0x8   : > { %s44_s17 = ssub.s32 %s1417_s12, %s1466_s15  ;;  %p54_p0 = scmp.ne.s32.totalorder %s1413_s11, %s1409_s10 }
   0x9   : > { %p45_p1 = scmp.eq.s32.totalorder %s44_s17, 0  ;;  %p55_p2 = scmp.eq.s32.totalorder %s1417_s12, 0 }
   0xa   : > { %p60_p3 = scmp.ne.s32.totalorder %s1409_s10, %s1405_s9  ;;  %p1696_p4 = scmp.eq.s32.totalorder %s1462_s13, 0 }
   0xb   : > { %s1478_s18 = scalar_select %p45_p1, %s1413_s11, %s47_s16  }
   0xc   : > { %p1480_p5 = por %p55_p2, %p54_p0  ;;  %p1486_p6 = por %p1696_p4, %p60_p3 }
   0xd   : > { %p84_p7 = scmp.eq.s32.totalorder %s1462_s13, 4  ;;  %p90_p8 = scmp.eq.s32.totalorder %s1003_s14, 4 }
   0xe   : > { %s1700_s20 = scalar_select %p1486_p6, 1, 0 }
   0xf   : > { %p1004_p9 = scmp.ge.s32.totalorder %s1417_s12, 1  ;;  %p97_p10 = scmp.lt.s32.totalorder %s1417_s12, 6 }
  0x10   : > { %p1493_p11 = por %p84_p7, %p54_p0  ;;  %p1497_p12 = por %p90_p8, %p60_p3 }
  0x11   : > { %p1501_p13 = pnand %p1004_p9, %p97_p10  ;;  %s1419_s24 = smov [#allocation2]  }
  0x12   : > { %s1701_s21 = scalar_select %p1493_p11, 1, 0 }
  0x13   : > { %s1702_s22 = scalar_select %p1497_p12, 1, 0 }
  0x14   : > { %s1703_s23 = scalar_select %p1501_p13, 1, 0 }
  0x15   : > { %p1177_p1 = pneg %p1501_p13  ;;  %s110_s25 = sshll.u32 %s1419_s24, 4  ;;  %s111_s25 = int_to_ptr.vmem [resolvable:$true] %s110_s25 }
  0x16   : > { %p1190_p2 = scmp.lt.s32.totalorder %s1417_s12, 5  ;;  %s121_s27 = sand.u32 1, %s1413_s11  }
  0x17   : > { %p1510_p0 = pnand %p1177_p1, %p1696_p4  ;;  %s1007_s29 = sshll.u32 %s121_s27, 9 }
  0x18   : > { %p1517_p3 = pnand %p1190_p2, %p1480_p5  ;;  %s1306_s30 = scalar_lea.vmem %s111_s25, 128 }
  0x19   : > { %p1297_p7 = pneg %p1510_p0  ;;  %p1307_p8 = scmp.ne.s32.totalorder %s111_s25, %s1306_s30 }
  0x1a   : > { %p1314_p12 = scmp.lt.s32.totalorder %s111_s25, %s111_s25  ;;  %p1315_p11 = scmp.lt.s32.totalorder %s1306_s30, %s1306_s30 }
  0x1b   : > { %p1309_p9 = pnand %p1307_p8, %p1297_p7 }
  0x1c   : > { %p1316_p1 = por %p1315_p11, %p1314_p12 }
  0x1d   : > { %p1310_p10 = pneg %p1309_p9 }
  0x1f   : > { %p1317_p4 = pnand %p1316_p1, %p1310_p10 }
  0x21   : > { %1320 = shalt.err (!%p1317_p4)
}
  0x22   : > { %1180 = dma.hbm_to_vmem [thread:$0]  (!%p1510_p0), %s1692_s0, 128, %s111_s25, [#allocation3]  }
  0x23   : > { %s1008_s5 = sshll.u32 %s1417_s12, 6  ;;  %s125_s6 = scalar_lea.vmem [#allocation5], %s1007_s29 }
  0x24   : > { %s131_s7 = sshll.u32 %s125_s6, 4  ;;  %s1532_s16 = scalar_lea.hbm %s1693_s1, %s1008_s5  ;;  %s1534_s7 = int_to_ptr.vmem [resolvable:$true] %s131_s7 }
  0x25   : > { %s1536_s17 = scalar_lea.sflag [#allocation6], %s121_s27  ;;  %s1321_s19 = scalar_lea.hbm %s1532_s16, 8192 }
  0x26   : > { %p1322_p4 = scmp.ne.s32.totalorder %s1532_s16, %s1321_s19  ;;  %p1323_p5 = pneg %p1517_p3 }
  0x27   : > { %s1326_s26 = scalar_lea.hbm %s1693_s1, 40960  ;;  %p1327_p2 = scmp.lt.s32.totalorder %s1532_s16, %s1693_s1 }
  0x28   : > { %p1324_p11 = pnand %p1323_p5, %p1322_p4  ;;  %p1328_p0 = scmp.lt.s32.totalorder %s1326_s26, %s1321_s19 }
  0x2a   : > { %p1325_p12 = pneg %p1324_p11  ;;  %p1329_p7 = por %p1328_p0, %p1327_p2 }
  0x2c   : > { %p1330_p8 = pnand %p1329_p7, %p1325_p12 }
  0x2e   : > { %1333 = shalt.err (!%p1330_p8)
}
  0x2f   : > { %s1334_s27 = scalar_lea.vmem %s1534_s7, 8192  ;;  %s1420_s3 = smov [#allocation5]  }
  0x30   : > { %p1335_p9 = scmp.ne.s32.totalorder %s1534_s7, %s1334_s27  ;;  %s1339_s4 = sshll.u32 %s1420_s3, 4  ;;  %s1340_s4 = int_to_ptr.vmem [resolvable:$false] %s1339_s4 }
  0x31   : > { %s1341_s5 = scalar_lea.vmem %s1340_s4, 16384  ;;  %p1342_p4 = scmp.lt.s32.totalorder %s1534_s7, %s1340_s4 }
  0x32   : > { %p1337_p10 = pnand %p1335_p9, %p1323_p5  ;;  %p1343_p11 = scmp.lt.s32.totalorder %s1341_s5, %s1334_s27 }
  0x34   : > { %p1338_p1 = pneg %p1337_p10  ;;  %p1344_p6 = por %p1343_p11, %p1342_p4 }
  0x36   : > { %p1345_p13 = pnand %p1344_p6, %p1338_p1 }
  0x38   : > { %1348 = shalt.err (!%p1345_p13)
}
  0x39   : > { %s1421_s6 = smov 320   ;;  %s1422_s8 = smov 64  }
  0x3a   : > { %s1423_s14 = smov 4   ;;  %p1706_p5 = scmp.ne.s32.totalorder %s1703_s23, 0 }
  0x3b   : > { %1184 = dma.hbm_to_vmem [thread:$0]  (!%p1517_p3), %s1532_s16, 8192, %s1534_s7, %s1536_s17, %s1421_s6, %s1422_s8, %s1423_s14  }
  0x3c   : > { %143 = sbr.rel (%p1706_p5) target bundleno = 350 (0x15e), region = 28  ;;  %p1707_p12 = scmp.eq.s32.totalorder (!%p1706_p5), %s1462_s13, 0 }
  0x41   : > { %1392 = dma.done.wait (%p1707_p12), [#allocation3], 128   ;;  %p1708_p2 = pmov %p1707_p12 }
  0x42   : > { %s1564_s19 = sand.u32 1, %s1409_s10   ;;  %p1709_p6 = scmp.ne.s32.totalorder %s1700_s20, 0 }
  0x43   : > { %1394 = vsyncadd (%p1708_p2), [#allocation3], 4294967168  ;;  %s1011_s24 = sshll.u32 %s1564_s19, 9  ;;  %s150_s25 = scalar_lea.sflag [#allocation6], %s1564_s19 }
  0x44   : > { %s1568_s26 = scalar_lea.vmem [#allocation5], %s1011_s24 }
  0x45   : > { %1396 = dma.done.wait (%p1709_p6), %s150_s25, 8192  }
  0x46   : > { %1398 = vsyncadd (%p1709_p6), %s150_s25, 4294959104  ;;  %v1230_v0 = vld [vmem:[%s1568_s26 + $0x78] sm:$0xff]   ;;  %v1234_v4 = vld [vmem:[%s1568_s26 + $0x70] sm:$0xff]   ;;  %v1424_v22 = vmov 1966171168   ;;  %v309_v24 = vlaneseq  ;;  %s1012_s20 = sshll.u32 %s1564_s19, 1 }
  0x47   : > { %v1231_v1 = vld [vmem:[%s1568_s26 + $0xf8] sm:$0xff]   ;;  %1081 = vmatprep.subr.bf16.mxu0 %v1230_v0  ;;  %v1235_v5 = vld [vmem:[%s1568_s26 + $0xf0] sm:$0xff]   ;;  %v1238_v8 = vld [vmem:[%s1568_s26 + $0x68] sm:$0xff]   ;;  %v307_v23 = vunpack.c.l.s4 %v1424_v22  ;;  %s1078_s23 = sshll.u32 %s1462_s13, 5  ;;  %s173_s28 = scalar_lea.vmem [#allocation7], %s1012_s20 }
  0x48   : > { %v1232_v2 = vld [vmem:[%s1568_s26 + $0x38] sm:$0xff]   ;;  %1103 = vmatprep.subr.bf16.mxu1 %v1231_v1  ;;  %v1236_v6 = vld [vmem:[%s1568_s26 + $0x30] sm:$0xff]   ;;  %v1239_v9 = vld [vmem:[%s1568_s26 + $0xe8] sm:$0xff]   ;;  %v310_v30 = vshrl.u32 %v309_v24, 7  ;;  %s921_s7 = sshll.u32 %s173_s28, 4  ;;  %s1656_s29 = scalar_lea.hbm %s1694_s2, %s1078_s23  ;;  %s922_s7 = int_to_ptr.vmem [resolvable:$true] %s921_s7 }
  0x49   : > { %v1233_v3 = vld [vmem:[%s1568_s26 + $0xb8] sm:$0xff]   ;;  %1082 = vmatpush3.bf16.msra.mxu0 %v1232_v2  ;;  %v1237_v7 = vld [vmem:[%s1568_s26 + $0xb0] sm:$0xff]   ;;  %v1240_v10 = vld [vmem:[%s1568_s26 + $0x28] sm:$0xff]   ;;  %v308_v29 = vunpack.c.0.s8 %v307_v23  ;;  %s908_s30 = scalar_lea.sflag [#allocation4], %s1564_s19  ;;  %s1349_s27 = scalar_lea.vmem %s922_s7, 32 }
  0x4a   : > { %1104 = vmatpush3.bf16.msra.mxu1 %v1233_v3  ;;  %1083 = vmatprep.subr.bf16.mxu0 %v1234_v4  ;;  %v1241_v11 = vld [vmem:[%s1568_s26 + $0xa8] sm:$0xff]   ;;  %v1242_v12 = vld [vmem:[%s1568_s26 + $0x60] sm:$0xff]   ;;  %v1246_v16 = vld [vmem:[%s1568_s26 + $0x58] sm:$0xff]   ;;  %p1350_p13 = scmp.ne.s32.totalorder %s922_s7, %s1349_s27  ;;  %p1710_p3 = scmp.ne.s32.totalorder %s1701_s21, 0 }
  0x4b   : > { %1105 = vmatprep.subr.bf16.mxu1 %v1235_v5  ;;  %v1243_v13 = vld [vmem:[%s1568_s26 + $0xe0] sm:$0xff]   ;;  %v1247_v17 = vld [vmem:[%s1568_s26 + $0xd8] sm:$0xff]   ;;  %v1250_v20 = vld [vmem:[%s1568_s26 + $0x50] sm:$0xff]   ;;  %v1604_v35 = vsub.s32 %v308_v29, %v310_v30  ;;  %s1425_s13 = smov [#allocation7]  }
  0x4c   : > { %v1244_v14 = vld [vmem:[%s1568_s26 + $0x20] sm:$0xff]   ;;  %v1248_v18 = vld [vmem:[%s1568_s26 + $0x18] sm:$0xff]   ;;  %v1251_v21 = vld [vmem:[%s1568_s26 + $0xd0] sm:$0xff]   ;;  %p1351_p0 = pnand %p1350_p13, %p1710_p3  ;;  %s1353_s3 = sshll.u32 %s1425_s13, 4  ;;  %s1354_s3 = int_to_ptr.vmem [resolvable:$false] %s1353_s3 }
  0x4d   : > { %1084 = vmatpush3.bf16.msra.mxu0 %v1236_v6  ;;  %v1245_v15 = vld [vmem:[%s1568_s26 + $0xa0] sm:$0xff]   ;;  %v1249_v19 = vld [vmem:[%s1568_s26 + $0x98] sm:$0xff]   ;;  %v1252_v25 = vld [vmem:[%s1568_s26 + $0x10] sm:$0xff]   ;;  %s1355_s4 = scalar_lea.vmem %s1354_s3, 64  ;;  %p1356_p8 = scmp.lt.s32.totalorder %s922_s7, %s1354_s3 }
  0x4e   : > { %1106 = vmatpush3.bf16.msra.mxu1 %v1237_v7  ;;  %1085 = vmatprep.subr.bf16.mxu0 %v1238_v8  ;;  %v1253_v26 = vld [vmem:[%s1568_s26 + $0x90] sm:$0xff]   ;;  %v1254_v27 = vld [vmem:[%s1568_s26 + $0x48] sm:$0xff]   ;;  %v1258_v33 = vld [vmem:[%s1568_s26 + $0x40] sm:$0xff]   ;;  %p1352_p7 = pneg %p1351_p0  ;;  %p1357_p9 = scmp.lt.s32.totalorder %s1355_s4, %s1349_s27 }
  0x4f   : > { %1107 = vmatprep.subr.bf16.mxu1 %v1239_v9  ;;  %v1255_v28 = vld [vmem:[%s1568_s26 + $0xc8] sm:$0xff]   ;;  %v1259_v34 = vld [vmem:[%s1568_s26 + $0xc0] sm:$0xff]   ;;  %v175_v38 = vld [vmem:[#allocation2] sm:$0xff] }
  0x50   : > { %v1256_v31 = vld [vmem:[%s1568_s26 + $0x8] sm:$0xff]   ;;  %v1260_v36 = vld [vmem:[%s1568_s26] sm:$0xff]   ;;  %v305_v39 = vcombine.high %v175_v38, %v175_v38  ;;  %v312_v40 = vrot.slane %v175_v38, %v1604_v35  ;;  %v1263_v41 = vld [vmem:[%s1568_s26 + $0x178] sm:$0xff]   ;;  %p1358_p10 = por %p1357_p9, %p1356_p8 }
  0x51   : > { %1086 = vmatpush3.bf16.msra.mxu0 %v1240_v10  ;;  %v1257_v32 = vld [vmem:[%s1568_s26 + $0x88] sm:$0xff]   ;;  %v1261_v37 = vld [vmem:[%s1568_s26 + $0x80] sm:$0xff]   ;;  %v1264_v42 = vld [vmem:[%s1568_s26 + $0x1f8] sm:$0xff]  }
  0x52   : > { %1108 = vmatpush3.bf16.msra.mxu1 %v1241_v11  ;;  %1087 = vmatprep.subr.bf16.mxu0 %v1242_v12  ;;  %v320_v43 = vcombine.high %v312_v40, %v312_v40  ;;  %v328_v44 = vrot.slane %v312_v40, %v1604_v35  ;;  %v1613_v45 = vrot.slane %v305_v39, %v1604_v35  ;;  %v1265_v47 = vld [vmem:[%s1568_s26 + $0x138] sm:$0xff]   ;;  %v1267_v50 = vld [vmem:[%s1568_s26 + $0x170] sm:$0xff]   ;;  %v1271_v57 = vld [vmem:[%s1568_s26 + $0x168] sm:$0xff]   ;;  %p1359_p1 = pnand %p1358_p10, %p1352_p7 }
  0x53   : > { %1109 = vmatprep.subr.bf16.mxu1 %v1243_v13  ;;  %v1266_v52 = vld [vmem:[%s1568_s26 + $0x1b8] sm:$0xff]   ;;  %v1268_v54 = vld [vmem:[%s1568_s26 + $0x1f0] sm:$0xff]   ;;  %v1272_v59 = vld [vmem:[%s1568_s26 + $0x1e8] sm:$0xff]  }
  0x54   : > { %v342_v46 = vrot.slane %v320_v43, %v1604_v35  ;;  %v321_v48 = vcombine.high %v1613_v45, %v1613_v45  ;;  %v350_v49 = vcombine.high %v328_v44, %v328_v44  ;;  %v1269_v55 = vld [vmem:[%s1568_s26 + $0x130] sm:$0xff]   ;;  %v1273_v60 = vld [vmem:[%s1568_s26 + $0x128] sm:$0xff]   ;;  %v1275_v61 = vld [vmem:[%s1568_s26 + $0x160] sm:$0xff]  }
  0x55   : > { %1088 = vmatpush3.bf16.msra.mxu0 %v1244_v14  ;;  %v1270_v58 = vld [vmem:[%s1568_s26 + $0x1b0] sm:$0xff]   ;;  %v1274_v62 = vld [vmem:[%s1568_s26 + $0x1a8] sm:$0xff]   ;;  %v1276_v63 = vld [vmem:[%s1568_s26 + $0x1e0] sm:$0xff]  }
  0x56   : > { %1110 = vmatpush3.bf16.msra.mxu1 %v1245_v15  ;;  %1089 = vmatprep.subr.bf16.mxu0 %v1246_v16  ;;  %v352_v51 = vcombine.high %v342_v46, %v342_v46  ;;  %v349_v53 = vrot.slane %v321_v48, %v1604_v35  ;;  %v1277_v0 = vld [vmem:[%s1568_s26 + $0x120] sm:$0xff]   ;;  %v1279_v1 = vld [vmem:[%s1568_s26 + $0x158] sm:$0xff]   ;;  %v1283_v5 = vld [vmem:[%s1568_s26 + $0x150] sm:$0xff]  }
  0x57   : > { %1111 = vmatprep.subr.bf16.mxu1 %v1247_v17  ;;  %778 = vmatprep.mubr.bf16.mxu0 %v342_v46  ;;  %v1278_v2 = vld [vmem:[%s1568_s26 + $0x1a0] sm:$0xff]   ;;  %v1280_v3 = vld [vmem:[%s1568_s26 + $0x1d8] sm:$0xff]   ;;  %v1284_v7 = vld [vmem:[%s1568_s26 + $0x1d0] sm:$0xff]   ;;  %v335_v17 = vrot.slane %v1613_v45, %v1604_v35 }
  0x58   : > { %818 = vmatprep.mubr.bf16.mxu1 %v352_v51  ;;  %v353_v56 = vcombine.high %v349_v53, %v349_v53  ;;  %v1281_v4 = vld [vmem:[%s1568_s26 + $0x118] sm:$0xff]   ;;  %v1285_v8 = vld [vmem:[%s1568_s26 + $0x110] sm:$0xff]   ;;  %v1287_v9 = vld [vmem:[%s1568_s26 + $0x148] sm:$0xff]  }
  0x59   : > { %1090 = vmatpush3.bf16.msra.mxu0 %v1248_v18  ;;  %v1282_v6 = vld [vmem:[%s1568_s26 + $0x198] sm:$0xff]   ;;  %v1286_v10 = vld [vmem:[%s1568_s26 + $0x190] sm:$0xff]   ;;  %v1288_v11 = vld [vmem:[%s1568_s26 + $0x1c8] sm:$0xff]  }
  0x5a   : > { %1112 = vmatpush3.bf16.msra.mxu1 %v1249_v19  ;;  %1091 = vmatprep.subr.bf16.mxu0 %v1250_v20  ;;  %v1289_v12 = vld [vmem:[%s1568_s26 + $0x108] sm:$0xff]   ;;  %v1291_v13 = vld [vmem:[%s1568_s26 + $0x140] sm:$0xff]   ;;  %v351_v19 = vcombine.high %v335_v17, %v335_v17 }
  0x5b   : > { %1113 = vmatprep.subr.bf16.mxu1 %v1251_v21  ;;  %v1290_v14 = vld [vmem:[%s1568_s26 + $0x188] sm:$0xff]   ;;  %v1292_v15 = vld [vmem:[%s1568_s26 + $0x1c0] sm:$0xff]  }
  0x5c   : > { %v1293_v16 = vld [vmem:[%s1568_s26 + $0x100] sm:$0xff]  }
  0x5d   : > { %1092 = vmatpush3.bf16.msra.mxu0 %v1252_v25  ;;  %v1294_v18 = vld [vmem:[%s1568_s26 + $0x180] sm:$0xff]  }
  0x5e   : > { %1114 = vmatpush3.bf16.msra.mxu1 %v1253_v26  ;;  %1093 = vmatprep.subr.bf16.mxu0 %v1254_v27 }
  0x5f   : > { %1115 = vmatprep.subr.bf16.mxu1 %v1255_v28 }
  0x61   : > { %1094 = vmatpush3.bf16.msra.mxu0 %v1256_v31 }
  0x62   : > { %1116 = vmatpush3.bf16.msra.mxu1 %v1257_v32  ;;  %1095 = vmatprep.subr.bf16.mxu0 %v1258_v33 }
  0x63   : > { %1117 = vmatprep.subr.bf16.mxu1 %v1259_v34 }
  0x65   : > { %1096 = vmatpush3.bf16.msra.mxu0 %v1260_v36 }
  0x66   : > { %1118 = vmatpush3.bf16.msra.mxu1 %v1261_v37  ;;  %1125 = vmatprep.subr.bf16.mxu0 %v1263_v41 }
  0x67   : > { %1147 = vmatprep.subr.bf16.mxu1 %v1264_v42 }
  0x68   : > { %779 = vmatmul.mubr.bf16.vlgmr.msra.gmra.mxu0 %v328_v44 }
  0x69   : > { %1126 = vmatpush3.bf16.msra.mxu0 %v1265_v47  ;;  %819 = vmatmul.mubr.bf16.vlgmr.msra.gmra.mxu1 %v350_v49 }
  0x6a   : > { %1127 = vmatprep.subr.bf16.mxu0 %v1267_v50  ;;  %1148 = vmatpush3.bf16.msra.mxu1 %v1266_v52 }
  0x6b   : > { %858 = vmatprep.mubr.bf16.mxu0 %v349_v53  ;;  %1149 = vmatprep.subr.bf16.mxu1 %v1268_v54 }
  0x6c   : > { %898 = vmatprep.mubr.bf16.mxu1 %v353_v56 }
  0x6d   : > { %1128 = vmatpush3.bf16.msra.mxu0 %v1269_v55 }
  0x6e   : > { %1129 = vmatprep.subr.bf16.mxu0 %v1271_v57  ;;  %1150 = vmatpush3.bf16.msra.mxu1 %v1270_v58 }
  0x6f   : > { %1151 = vmatprep.subr.bf16.mxu1 %v1272_v59 }
  0x71   : > { %1130 = vmatpush3.bf16.msra.mxu0 %v1273_v60 }
  0x72   : > { %1131 = vmatprep.subr.bf16.mxu0 %v1275_v61  ;;  %1152 = vmatpush3.bf16.msra.mxu1 %v1274_v62 }
  0x73   : > { %1153 = vmatprep.subr.bf16.mxu1 %v1276_v63 }
  0x75   : > { %1132 = vmatpush3.bf16.msra.mxu0 %v1277_v0 }
  0x76   : > { %1133 = vmatprep.subr.bf16.mxu0 %v1279_v1  ;;  %1154 = vmatpush3.bf16.msra.mxu1 %v1278_v2 }
  0x77   : > { %1155 = vmatprep.subr.bf16.mxu1 %v1280_v3 }
  0x79   : > { %1134 = vmatpush3.bf16.msra.mxu0 %v1281_v4 }
  0x7a   : > { %1135 = vmatprep.subr.bf16.mxu0 %v1283_v5  ;;  %1156 = vmatpush3.bf16.msra.mxu1 %v1282_v6 }
  0x7b   : > { %1157 = vmatprep.subr.bf16.mxu1 %v1284_v7 }
  0x7d   : > { %1136 = vmatpush3.bf16.msra.mxu0 %v1285_v8 }
  0x7e   : > { %1137 = vmatprep.subr.bf16.mxu0 %v1287_v9  ;;  %1158 = vmatpush3.bf16.msra.mxu1 %v1286_v10 }
  0x7f   : > { %1159 = vmatprep.subr.bf16.mxu1 %v1288_v11 }
  0x81   : > { %1138 = vmatpush3.bf16.msra.mxu0 %v1289_v12 }
  0x82   : > { %1139 = vmatprep.subr.bf16.mxu0 %v1291_v13  ;;  %1160 = vmatpush3.bf16.msra.mxu1 %v1290_v14 }
  0x83   : > { %1161 = vmatprep.subr.bf16.mxu1 %v1292_v15 }
  0x85   : > { %1140 = vmatpush3.bf16.msra.mxu0 %v1293_v16 }
  0x86   : > { %1162 = vmatpush3.bf16.msra.mxu1 %v1294_v18 }
  0x88   : > { %859 = vmatmul.mubr.bf16.vlgmr.msra.gmra.mxu0 %v335_v17 }
  0x89   : > { %899 = vmatmul.mubr.bf16.vlgmr.msra.gmra.mxu1 %v351_v19 }
 0x128   : > { %v1097_v20 = vpop.f32.mrf.mxu0 }
 0x129   : > { %v1119_v21 = vpop.f32.mrf.mxu1 }
 0x12a   : > { %v1098_v22 = vpop.f32.mrf.mxu0 }
 0x12b   : > { %v1120_v23 = vpop.f32.mrf.mxu1  ;;  %v1099_v28 = vadd.f32 %v1098_v22, %v1097_v20 }
 0x12c   : > { %v1100_v24 = vpop.f32.mrf.mxu0  ;;  %v1121_v29 = vadd.f32 %v1120_v23, %v1119_v21 }
 0x12d   : > { %v1122_v25 = vpop.f32.mrf.mxu1 }
 0x12e   : > { %v1101_v26 = vpop.f32.mrf.mxu0  ;;  %v821_v33 = vadd.f32 %v1121_v29, %v1099_v28 }
 0x12f   : > { %v1123_v27 = vpop.f32.mrf.mxu1 }
 0x148   : > { %v1141_v30 = vpop.f32.mrf.mxu0 }
 0x149   : > { %v1163_v31 = vpop.f32.mrf.mxu1 }
 0x14a   : > { %v1142_v32 = vpop.f32.mrf.mxu0 }
 0x14b   : > { %v1143_v34 = vadd.f32 %v1142_v32, %v1141_v30  ;;  %v1164_v35 = vpop.f32.mrf.mxu1 }
 0x14c   : > { %v1144_v36 = vpop.f32.mrf.mxu0  ;;  %v1165_v38 = vadd.f32 %v1164_v35, %v1163_v31 }
 0x14d   : > { %v861_v37 = vadd.f32 %v1143_v34, %v821_v33  ;;  %v1166_v39 = vpop.f32.mrf.mxu1 }
 0x14e   : > { %v1145_v40 = vpop.f32.mrf.mxu0 }
 0x14f   : > { %v901_v41 = vadd.f32 %v1165_v38, %v861_v37  ;;  %v1167_v42 = vpop.f32.mrf.mxu1 }
 0x151   : > { %906 = vst [vmem:[%s173_s28] sm:$0x3] %v901_v41 }
 0x152   : > { %1362 = shalt.err (!%p1359_p1)
}
 0x153   : > { %s1363_s5 = scalar_lea.hbm %s1656_s29, 32  ;;  %s1367_s14 = scalar_lea.hbm %s1694_s2, 160 }
 0x154   : > { %p1364_p4 = scmp.ne.s32.totalorder %s1656_s29, %s1363_s5  ;;  %p1368_p12 = scmp.lt.s32.totalorder %s1656_s29, %s1694_s2 }
 0x155   : > { %p1369_p2 = scmp.lt.s32.totalorder %s1367_s14, %s1363_s5 }
 0x156   : > { %p1365_p11 = pnand %p1364_p4, %p1710_p3 }
 0x157   : > { %p1370_p6 = por %p1369_p2, %p1368_p12 }
 0x158   : > { %p1366_p5 = pneg %p1365_p11 }
 0x15a   : > { %p1371_p13 = pnand %p1370_p6, %p1366_p5 }
 0x15c   : > { %1374 = shalt.err (!%p1371_p13)
}
 0x15d   : > { %1175 = dma.vmem_to_hbm [thread:$0]  (%p1710_p3), %s922_s7, 32, %s1656_s29, %s908_s30  }
 0x15e PF: > { %p1192_p0 = scmp.ge.s32.totalorder %s1417_s12, 2  ;;  %s933_s25 = sand.u32 1, %s1405_s9  }
 0x15f   : > { %p1711_p7 = scmp.ne.s32.totalorder %s1702_s22, 0  ;;  %s934_s26 = scalar_lea.sflag [#allocation4], %s933_s25 }
 0x161   : > { %p1186_p8 = pnand %p1192_p0, %p1711_p7 }
 0x163   : > { %p1187_p9 = pneg %p1186_p8 }
 0x165   : > { %1400 = dma.done.wait (%p1187_p9), %s934_s26, 32  }
 0x166   : > { %1402 = vsyncadd (%p1187_p9), %s934_s26, 4294967264  ;;  %p16_p10 = scmp.ge.s32.totalorder %s1466_s15, 7   ;;  %s1712_s9 = smov %s1409_s10 }
 0x167   : > { %s1713_s10 = smov %s1413_s11  ;;  %s1714_s11 = smov %s1478_s18 }
 0x168   : > { %s1715_s12 = smov %s1466_s15  ;;  %18 = sbr.rel (!%p16_p10) target bundleno = 6 (0x6), region = 78 }
 0x16d   :  { %939 = vsyncpa [#allocation3], 1 }
 0x16e   :  { %941 = vsyncpa [#allocation3 + $0x1], 1 }
 0x16f   :  { %942 = vsyncpa [#allocation6], 1 }
 0x170   :  { %944 = vsyncpa [#allocation6 + $0x1], 1 }
 0x171   :  { %945 = vsyncpa [#allocation4], 1 }
 0x172   :  { %947 = vsyncpa [#allocation4 + $0x1], 1 }

</bundles_post_ra>
